<compile_context>
chip_gen: v7x
topology: tpu7x:2x2x1
jax: 0.10.0
libtpu: 0.0.40
codegen_flags: <defaults>
</compile_context>

<pallas_src>
import functools

import jax
import jax.numpy as jnp
from jax.experimental import pallas as pl
from jax.experimental.pallas import tpu as pltpu


def _focal_loss_kernel(logits_ref, target_ref, out_ref, *, gamma, hw, tile_r,
                       need_mask):
    # logits_ref: (C, R, 128) native dtype    target_ref: (R, 128) int8/16/32
    # out_ref:    (8, 128) f32 per-batch accumulator (resident across pi axis)
    pi = pl.program_id(1)

    @pl.when(pi == 0)
    def _init():
        out_ref[...] = jnp.zeros_like(out_ref)

    x = logits_ref[...].astype(jnp.float32)               # (C, R, 128)
    t = target_ref[...].astype(jnp.int32)                 # (R, 128)

    cls_idx = jax.lax.broadcasted_iota(jnp.int32, x.shape, 0)
    onehot = cls_idx == t[None, :, :]                     # (C, R, 128)

    # stable softmax pieces; all class reductions are over the LEADING axis
    m = jnp.max(x, axis=0)                                 # (R, 128)
    logit_t = jnp.sum(jnp.where(onehot, x, 0.0), axis=0)   # (R, 128)
    e = jnp.exp(x - m[None, :, :])                         # the only per-class exp
    sumexp = jnp.sum(e, axis=0)                            # (R, 128)
    e_t = jnp.sum(jnp.where(onehot, e, 0.0), axis=0)       # (R, 128)

    ce = jnp.log(sumexp) + (m - logit_t)                   # = logsumexp - logit_t
    pt = e_t / sumexp                                      # == exp(-ce), no 2nd exp

    # clamp fp slop where pt marginally exceeds 1 (PyTorch-equivalent up to fp noise)
    w = jnp.maximum(1.0 - pt, 0.0)

    g = float(gamma)
    if g == int(g) and 0 <= int(g) <= 32:
        k = int(g)
        if k == 0:
            wg = jnp.ones_like(w)
        else:
            # binary exponentiation starting from w (gamma=2 -> single multiply)
            wg = None
            base = w
            while True:
                if k & 1:
                    wg = base if wg is None else wg * base
                k >>= 1
                if k == 0:
                    break
                base = base * base
    else:
        # non-integer gamma: exp(g*log(w)); tiny clamp avoids log(0) (matches
        # torch pow except exactly-at-0, where torch gives 0 and so do we)
        wg = jnp.exp(g * jnp.log(jnp.maximum(w, 1e-30)))

    focal = wg * ce                                        # (R, 128)

    if need_mask:
        # pixels beyond the original H*W (zero-padded in the wrapper) -> 0 loss
        base_idx = pi * (tile_r * 128)
        row = jax.lax.broadcasted_iota(jnp.int32, focal.shape, 0)
        lane = jax.lax.broadcasted_iota(jnp.int32, focal.shape, 1)
        valid = (base_idx + row * 128 + lane) < hw
        focal = jnp.where(valid, focal, 0.0)

    # accumulate into the lane-dense (8,128) output slab (leading-axis VPU adds)
    r = focal.shape[0]
    r8 = (r // 8) * 8
    if r8 > 0:
        out_ref[...] += jnp.sum(focal[:r8].reshape(r8 // 8, 8, 128), axis=0)
    if r8 < r:
        out_ref[0:1, :] += jnp.sum(focal[r8:, :], axis=0, keepdims=True)


def focal_loss(logits_nchw, target_nhw, gamma=2.0, reduction='mean',
               tile_budget_bytes=12 * 1024 * 1024):
    """Focal loss matching the PyTorch module with weight=None."""
    n, c, h, w = logits_nchw.shape
    hw = h * w
    num_pixels = n * hw
    lane = 128

    itemsize = jnp.dtype(logits_nchw.dtype).itemsize
    if c <= 128:
        tgt_dtype = jnp.int8          # class ids fit in int8
    elif c <= 32768:
        tgt_dtype = jnp.int16
    else:
        tgt_dtype = jnp.int32
    tgt_itemsize = jnp.dtype(tgt_dtype).itemsize

    # Per-row (128 pixels) tile bytes: double-buffered HBM inputs + the f32
    # upcast / elementwise temporaries (~(2C+10) f32 per pixel).
    bytes_per_row = lane * (2 * c * itemsize + 2 * tgt_itemsize + (2 * c + 10) * 4)
    cap_rows = max(8, tile_budget_bytes // bytes_per_row)

    rows0 = (hw + lane - 1) // lane
    if rows0 <= cap_rows:
        # whole image (per batch element) in one tile; full-dim block is always legal
        rows, tile_r = rows0, rows0
    else:
        # tile the row axis; multiples of 32 keep int8/bf16 sublane tiling legal
        rows = ((rows0 + 31) // 32) * 32
        tile_r = 32
        for t in range((min(cap_rows, rows) // 32) * 32, 31, -32):
            if rows % t == 0:
                tile_r = t
                break
    hw_pad = rows * lane
    grid_p = rows // tile_r
    need_mask = hw_pad != hw

    # Free reshapes; logits kept in their native dtype (bf16 stays bf16 in HBM).
    logits = logits_nchw.reshape(n, c, hw)
    target = target_nhw.reshape(n, hw).astype(tgt_dtype)
    if need_mask:
        # TODO(synk): one extra XLA pad/copy when H*W is not a multiple of 128.
        logits = jnp.pad(logits, ((0, 0), (0, 0), (0, hw_pad - hw)))
        target = jnp.pad(target, ((0, 0), (0, hw_pad - hw)))
    logits = logits.reshape(n, c, rows, lane)
    target = target.reshape(n, rows, lane)

    kernel = functools.partial(
        _focal_loss_kernel, gamma=float(gamma), hw=hw, tile_r=tile_r,
        need_mask=need_mask)

    # Advisory cost hint: HBM-bandwidth bound, MXU unused.
    flops = (8 * c + 12) * num_pixels
    transcendentals = (c + 2) * num_pixels
    bytes_accessed = (c * itemsize + tgt_itemsize) * n * hw_pad + n * 8 * lane * 4

    partials = pl.pallas_call(
        kernel,
        out_shape=jax.ShapeDtypeStruct((n, 8, lane), jnp.float32),
        grid_spec=pltpu.PrefetchScalarGridSpec(
            num_scalar_prefetch=0,
            grid=(n, grid_p),
            in_specs=[
                pl.BlockSpec((None, c, tile_r, lane), lambda b, pi: (b, 0, pi, 0)),
                pl.BlockSpec((None, tile_r, lane), lambda b, pi: (b, pi, 0)),
            ],
            # constant block index across pi -> resident per-batch accumulator
            out_specs=pl.BlockSpec((None, 8, lane), lambda b, pi: (b, 0, 0)),
        ),
        compiler_params=pltpu.CompilerParams(
            dimension_semantics=("parallel", "arbitrary"),
            vmem_limit_bytes=32 * 1024 * 1024,
        ),
        cost_estimate=pl.CostEstimate(
            flops=int(flops),
            transcendentals=int(transcendentals),
            bytes_accessed=int(bytes_accessed),
        ),
    )(logits, target)

    total = jnp.sum(partials)
    if reduction == 'mean':
        return total / jnp.float32(num_pixels)
    elif reduction == 'sum':
        return total
    else:
        # TODO(synk): reduction='none' (per-pixel map output) not implemented.
        raise NotImplementedError("reduction must be 'mean' or 'sum'")


def _focal_loss_ref(logits_nchw, target_nhw, gamma=2.0, reduction='mean'):
    # plain-JAX reference mirroring F.cross_entropy(..., reduction='none') + focal
    n, c, h, w = logits_nchw.shape
    x = jnp.transpose(logits_nchw, (0, 2, 3, 1)).reshape(-1, c).astype(jnp.float32)
    t = target_nhw.reshape(-1)
    lse = jax.nn.logsumexp(x, axis=-1)
    logit_t = jnp.take_along_axis(x, t[:, None], axis=-1)[:, 0]
    ce = lse - logit_t
    pt = jnp.exp(-ce)
    focal = (1.0 - pt) ** gamma * ce
    return jnp.mean(focal) if reduction == 'mean' else jnp.sum(focal)


if __name__ == "__main__":
    key = jax.random.PRNGKey(0)

    # (shape, gamma, kwargs) — exercise single-tile, padded/masked, and
    # multi-tile accumulator paths, integer and non-integer gamma.
    tests = [
        ((2, 4, 16, 16), 2.0, {}),                                 # single tile
        ((1, 5, 40, 40), 1.5, {}),                                 # hw % 128 != 0 -> pad+mask
        ((2, 3, 128, 128), 2.0, {"tile_budget_bytes": 11520 * 40}),  # forced multi-tile accum
    ]

    ok = True
    for i, (shape, gamma, kwargs) in enumerate(tests):
        key, k1, k2 = jax.random.split(key, 3)
        n, c, h, w = shape
        logits = jax.random.normal(k1, shape, dtype=jnp.float32)
        target = jax.random.randint(k2, (n, h, w), 0, c, dtype=jnp.int32)

        loss = jax.block_until_ready(focal_loss(logits, target, gamma=gamma, **kwargs))
        ref = _focal_loss_ref(logits, target, gamma=gamma)
        if not jnp.allclose(loss, ref, atol=1e-5, rtol=1e-4):
            ok = False
            print(f"MISMATCH test {i}: kernel={loss} ref={ref}")

    # also check reduction='sum' on the first config
    k1, k2 = jax.random.split(jax.random.PRNGKey(1))
    logits = jax.random.normal(k1, (2, 4, 16, 16), dtype=jnp.float32)
    target = jax.random.randint(k2, (2, 16, 16), 0, 4, dtype=jnp.int32)
    s = jax.block_until_ready(focal_loss(logits, target, gamma=2.0, reduction='sum'))
    rs = _focal_loss_ref(logits, target, gamma=2.0, reduction='sum')
    if not jnp.allclose(s, rs, atol=1e-4, rtol=1e-4):
        ok = False
        print(f"MISMATCH sum: kernel={s} ref={rs}")

    if ok:
        print("KERNEL_OK")
</pallas_src>

<mosaic_0001>
module attributes {stable_mosaic.version = 11 : i64} {
  func.func @_focal_loss_kernel(%arg0: i32, %arg1: i32, %arg2: memref<1x4x2x128xf32, #tpu.memory_space<vmem>>, %arg3: memref<1x2x128xi8, #tpu.memory_space<vmem>>, %arg4: memref<1x8x128xf32, #tpu.memory_space<vmem>>) attributes {dimension_semantics = [#tpu.dimension_semantics<parallel>, #tpu.dimension_semantics<arbitrary>], iteration_bounds = array<i64: 2, 1>, scalar_prefetch = 0 : i64, scratch_operands = 0 : i64, tpu.core_type = #tpu.core_type<tc>, window_params = [{transform_indices = @transform_0, window_bounds = array<i64: 1, 4, 2, 128>}, {transform_indices = @transform_1, window_bounds = array<i64: 1, 2, 128>}, {transform_indices = @transform_2, window_bounds = array<i64: 1, 8, 128>}]} {
    %c0_i32 = arith.constant 0 : i32
    %0 = arith.cmpi eq, %arg1, %c0_i32 : i32
    %1 = arith.extui %0 : i1 to i32
    %c0_i32_0 = arith.constant 0 : i32
    %2 = arith.cmpi ne, %1, %c0_i32_0 : i32
    scf.if %2 {
      %cst_21 = arith.constant 0.000000e+00 : f32
      %42 = vector.broadcast %cst_21 : f32 to vector<8x128xf32>
      %c0_22 = arith.constant 0 : index
      %c0_23 = arith.constant 0 : index
      %c0_24 = arith.constant 0 : index
      %43 = vector.load %arg4[%c0_22, %c0_23, %c0_24] : memref<1x8x128xf32, #tpu.memory_space<vmem>>, vector<1x8x128xf32>
      %44 = vector.shape_cast %43 : vector<1x8x128xf32> to vector<8x128xf32>
      %45 = vector.shape_cast %42 : vector<8x128xf32> to vector<1x8x128xf32>
      tpu.vector_store %arg4[%c0_22, %c0_23, %c0_24], %45 {strides = array<i32>} : memref<1x8x128xf32, #tpu.memory_space<vmem>>, vector<1x8x128xf32>,
    } else {
    }
    %c0 = arith.constant 0 : index
    %c0_1 = arith.constant 0 : index
    %c0_2 = arith.constant 0 : index
    %c0_3 = arith.constant 0 : index
    %3 = vector.load %arg2[%c0, %c0_1, %c0_2, %c0_3] : memref<1x4x2x128xf32, #tpu.memory_space<vmem>>, vector<1x4x2x128xf32>
    %4 = vector.shape_cast %3 : vector<1x4x2x128xf32> to vector<4x2x128xf32>
    %c0_4 = arith.constant 0 : index
    %c0_5 = arith.constant 0 : index
    %c0_6 = arith.constant 0 : index
    %5 = vector.load %arg3[%c0_4, %c0_5, %c0_6] : memref<1x2x128xi8, #tpu.memory_space<vmem>>, vector<1x2x128xi8>
    %6 = vector.shape_cast %5 : vector<1x2x128xi8> to vector<2x128xi8>
    %7 = arith.extsi %6 : vector<2x128xi8> to vector<2x128xi32>
    %8 = tpu.iota {dimensions = array<i32: 0>} : vector<4x2x128xi32>
    %9 = vector.shape_cast %7 : vector<2x128xi32> to vector<1x2x128xi32>
    %10 = vector.broadcast %9 : vector<1x2x128xi32> to vector<4x2x128xi32>
    %11 = arith.cmpi eq, %8, %10 : vector<4x2x128xi32>
    %cst = arith.constant dense<0xFF800000> : vector<2x128xf32>
    %12 = vector.multi_reduction <maximumf>, %4, %cst [0] : vector<4x2x128xf32> to vector<2x128xf32>
    %cst_7 = arith.constant 0.000000e+00 : f32
    %13 = vector.broadcast %cst_7 : f32 to vector<4x2x128xf32>
    %14 = arith.select %11, %4, %13 : vector<4x2x128xi1>, vector<4x2x128xf32>
    %cst_8 = arith.constant dense<0.000000e+00> : vector<2x128xf32>
    %15 = vector.multi_reduction <add>, %14, %cst_8 [0] : vector<4x2x128xf32> to vector<2x128xf32>
    %16 = vector.shape_cast %12 : vector<2x128xf32> to vector<1x2x128xf32>
    %17 = vector.broadcast %16 : vector<1x2x128xf32> to vector<4x2x128xf32>
    %18 = arith.subf %4, %17 : vector<4x2x128xf32>
    %19 = math.exp %18 : vector<4x2x128xf32>
    %cst_9 = arith.constant dense<0.000000e+00> : vector<2x128xf32>
    %20 = vector.multi_reduction <add>, %19, %cst_9 [0] : vector<4x2x128xf32> to vector<2x128xf32>
    %cst_10 = arith.constant 0.000000e+00 : f32
    %21 = vector.broadcast %cst_10 : f32 to vector<4x2x128xf32>
    %22 = arith.select %11, %19, %21 : vector<4x2x128xi1>, vector<4x2x128xf32>
    %cst_11 = arith.constant dense<0.000000e+00> : vector<2x128xf32>
    %23 = vector.multi_reduction <add>, %22, %cst_11 [0] : vector<4x2x128xf32> to vector<2x128xf32>
    %24 = math.log %20 : vector<2x128xf32>
    %25 = arith.subf %12, %15 : vector<2x128xf32>
    %26 = arith.addf %24, %25 : vector<2x128xf32>
    %27 = arith.divf %23, %20 : vector<2x128xf32>
    %cst_12 = arith.constant 1.000000e+00 : f32
    %28 = vector.broadcast %cst_12 : f32 to vector<2x128xf32>
    %29 = arith.subf %28, %27 : vector<2x128xf32>
    %cst_13 = arith.constant 0.000000e+00 : f32
    %30 = vector.broadcast %cst_13 : f32 to vector<2x128xf32>
    %31 = arith.maximumf %29, %30 : vector<2x128xf32>
    %32 = arith.mulf %31, %31 : vector<2x128xf32>
    %33 = arith.mulf %32, %26 : vector<2x128xf32>
    %c0_14 = arith.constant 0 : index
    %c0_15 = arith.constant 0 : index
    %c0_16 = arith.constant 0 : index
    %34 = vector.load %arg4[%c0_14, %c0_15, %c0_16] : memref<1x8x128xf32, #tpu.memory_space<vmem>>, vector<1x1x128xf32>
    %35 = vector.shape_cast %34 : vector<1x1x128xf32> to vector<1x128xf32>
    %cst_17 = arith.constant dense<0.000000e+00> : vector<128xf32>
    %36 = vector.multi_reduction <add>, %33, %cst_17 [0] : vector<2x128xf32> to vector<128xf32>
    %37 = vector.shape_cast %36 : vector<128xf32> to vector<1x128xf32>
    %38 = arith.addf %35, %37 : vector<1x128xf32>
    %c0_18 = arith.constant 0 : index
    %c0_19 = arith.constant 0 : index
    %c0_20 = arith.constant 0 : index
    %39 = vector.load %arg4[%c0_18, %c0_19, %c0_20] : memref<1x8x128xf32, #tpu.memory_space<vmem>>, vector<1x1x128xf32>
    %40 = vector.shape_cast %39 : vector<1x1x128xf32> to vector<1x128xf32>
    %41 = vector.shape_cast %38 : vector<1x128xf32> to vector<1x1x128xf32>
    tpu.vector_store %arg4[%c0_18, %c0_19, %c0_20], %41 {strides = array<i32>} : memref<1x8x128xf32, #tpu.memory_space<vmem>>, vector<1x1x128xf32>,
    return
  }
  func.func @transform_0(%arg0: i32, %arg1: i32) -> (i32, i32, i32, i32) {
    %c0_i32 = arith.constant 0 : i32
    %c0_i32_0 = arith.constant 0 : i32
    %c0_i32_1 = arith.constant 0 : i32
    return %arg0, %c0_i32, %arg1, %c0_i32_0 : i32, i32, i32, i32
  }
  func.func @transform_1(%arg0: i32, %arg1: i32) -> (i32, i32, i32) {
    %c0_i32 = arith.constant 0 : i32
    %c0_i32_0 = arith.constant 0 : i32
    return %arg0, %arg1, %c0_i32 : i32, i32, i32
  }
  func.func @transform_2(%arg0: i32, %arg1: i32) -> (i32, i32, i32) {
    %c0_i32 = arith.constant 0 : i32
    %c0_i32_0 = arith.constant 0 : i32
    %c0_i32_1 = arith.constant 0 : i32
    return %arg0, %c0_i32, %c0_i32_0 : i32, i32, i32
  }
}

</mosaic_0001>

<bundles_post_ra>
// kernel: tpu_custom_call.1
= control target key start
LH: loop header
LB: loop body
LE: loop exit
PB: predicated region body
PF: predicated region fallthrough
CT: control target
= control target key end

     0   :  { %7 = vsyncpa [#allocation3], 0  ;;  %s826_s0 = inlined_call_operand.hbm [shape: f32[2,4,2,128], index: 0, kind: input, shape index: {}]   ;;  %s827_s1 = inlined_call_operand.vmem [shape: s8[2,2,128], index: 1, kind: input, shape index: {}]   ;;  %s828_s2 = inlined_call_operand.hbm [shape: f32[2,8,128], index: 2, kind: output, shape index: {}]  }
   0x1   :  { %9 = vsyncpa [#allocation3 + $0x1], 0 }
   0x2   :  { %10 = vsyncpa [#allocation4], 0 }
   0x3   :  { %12 = vsyncpa [#allocation4 + $0x1], 0  ;;  %s618_s9 = smov 0   ;;  %s620_s10 = smov 0  }
   0x4   :  { %s622_s11 = smov 0   ;;  %s624_s12 = smov 0  }
   0x5   :  { %s626_s13 = smov 0   ;;  %s628_s14 = smov 0  }
   0x6 LB: > { %s392_s15 = sadd.s32 4294967295, %s596_s14   ;;  %s393_s16 = sadd.s32 4294967294, %s596_s14   ;;  %s596_s14 = sphi %s628_s14, %s18_s14   ;;  %s592_s13 = sphi %s626_s13, %s843_s13   ;;  %s588_s12 = sphi %s624_s12, %s842_s12   ;;  %s584_s11 = sphi %s622_s11, %s841_s11   ;;  %s580_s10 = sphi %s620_s10, %s840_s10   ;;  %s576_s9 = sphi %s618_s9, %s839_s9  }
   0x7   : > { %s30_s17 = sadd.s32 1, %s592_s13  ;;  %s39_s18 = sadd.s32 1, %s584_s11 }
   0x8   : > { %p32_p0 = scmp.ge.s32.totalorder %s30_s17, 2  ;;  %p46_p1 = scmp.ne.s32.totalorder %s584_s11, %s580_s10 }
   0x9   : > { %p47_p2 = scmp.eq.s32.totalorder %s596_s14, 0  ;;  %p52_p3 = scmp.ne.s32.totalorder %s580_s10, %s576_s9 }
   0xa   : > { %s845_s17 = smov (%p32_p0, %s30_s17), 0  ;;  %p53_p5 = scmp.eq.s32.totalorder %s392_s15, 0 }
   0xb   : > { %p659_p4 = por %p47_p2, %p46_p1  ;;  %s34_s20 = ssub.s32 %s592_s13, %s845_s17 }
   0xc   : > { %p104_p6 = scmp.eq.s32.totalorder %s392_s15, 1  ;;  %p37_p7 = scmp.eq.s32.totalorder %s34_s20, 0 }
   0xd   : > { %p665_p8 = por %p53_p5, %p52_p3  ;;  %p110_p10 = scmp.eq.s32.totalorder %s393_s16, 1 }
   0xe   : > { %p669_p9 = por %p104_p6, %p46_p1  ;;  %p419_p13 = scmp.lt.s32.totalorder %s596_s14, 2 }
   0xf   : > { %s674_s23 = scalar_select %p37_p7, %s584_s11, %s39_s18  }
  0x10   : > { %s832_s22 = scalar_select %p669_p9, 1, 0 }
  0x11   : > { %p676_p11 = por %p110_p10, %p52_p3  ;;  %s130_s25 = sand.u32 1, %s584_s11  }
  0x12   : > { %s396_s26 = sshll.u32 %s130_s25, 3  ;;  %s406_s27 = sshll.u32 %s592_s13, 7 }
  0x13   : > { %s833_s24 = scalar_select %p676_p11, 1, 0 }
  0x14   : > { %s687_s30 = scalar_lea.hbm %s826_s0, %s406_s27  ;;  %s134_s3 = scalar_lea.vmem [#allocation2], %s396_s26 }
  0x15   : > { %s142_s4 = sshll.u32 %s134_s3, 4  ;;  %p693_p0 = pnand %p419_p13, %p659_p4  ;;  %s689_s4 = int_to_ptr.vmem [resolvable:$true] %s142_s4 }
  0x16   : > { %s698_s6 = scalar_lea.sflag [#allocation3], %s130_s25  ;;  %s484_s7 = scalar_lea.hbm %s687_s30, 128 }
  0x17   : > { %p485_p2 = scmp.ne.s32.totalorder %s687_s30, %s484_s7  ;;  %p486_p3 = pneg %p693_p0 }
  0x18   : > { %s489_s16 = scalar_lea.hbm %s826_s0, 256  ;;  %p490_p4 = scmp.lt.u32.totalorder %s687_s30, %s826_s0 }
  0x19   : > { %p487_p5 = pnand %p486_p3, %p485_p2  ;;  %p491_p7 = scmp.lt.u32.totalorder %s489_s16, %s484_s7 }
  0x1a   : > { %p493_p13 = scmp.lt.u32.totalorder %s484_s7, %s687_s30 }
  0x1b   : > { %p488_p6 = pneg %p487_p5  ;;  %p492_p10 = por %p491_p7, %p490_p4 }
  0x1d   : > { %p494_p12 = por %p493_p13, %p492_p10 }
  0x1f   : > { %p495_p1 = pnand %p494_p12, %p488_p6 }
  0x21   : > { %498 = shalt.err (!%p495_p1)
}
  0x22   : > { %s499_s20 = scalar_lea.vmem %s689_s4, 128  ;;  %s598_s25 = smov [#allocation2]  }
  0x23   : > { %p500_p2 = scmp.ne.s32.totalorder %s689_s4, %s499_s20  ;;  %s504_s26 = sshll.u32 %s598_s25, 4  ;;  %s505_s26 = int_to_ptr.vmem [resolvable:$false] %s504_s26 }
  0x24   : > { %s506_s27 = scalar_lea.vmem %s505_s26, 256  ;;  %p507_p9 = scmp.lt.s32.totalorder %s689_s4, %s505_s26 }
  0x25   : > { %p502_p5 = pnand %p500_p2, %p486_p3  ;;  %p508_p4 = scmp.lt.s32.totalorder %s506_s27, %s499_s20 }
  0x27   : > { %p503_p11 = pneg %p502_p5  ;;  %p509_p7 = por %p508_p4, %p507_p9 }
  0x29   : > { %p510_p10 = pnand %p509_p7, %p503_p11 }
  0x2b   : > { %513 = shalt.err (!%p510_p10)
}
  0x2c   : > { %s599_s28 = smov 32   ;;  %s600_s29 = smov 2  }
  0x2d   : > { %414 = dma.hbm_to_vmem [thread:$0]  (!%p693_p0), %s687_s30, 128, %s689_s4, %s698_s6, %s599_s28, %s599_s28, %s600_s29  }
  0x2e   : > { %p159_p12 = scmp.lt.s32.totalorder %s596_s14, 3  ;;  %p835_p1 = scmp.ge.s32.totalorder %s596_s14, 1 }
  0x30   : > { %p160_p3 = pnand %p835_p1, %p159_p12 }
  0x31   : > { %s730_s3 = sand.u32 (!%p160_p3), 1, %s580_s10  }
  0x32   : > { %163 = sbr.rel (%p160_p3) target bundleno = 139 (0x8b), region = 28  ;;  %s400_s7 = sshll.u32 (!%p160_p3), %s730_s3, 3 }
  0x33   : > { %s166_s8 = scalar_lea.sflag (!%p160_p3), [#allocation3], %s730_s3  ;;  %s169_s15 = scalar_lea.vmem (!%p160_p3), [#allocation2], %s400_s7 }
  0x39   : > { %567 = dma.done.wait (%p665_p8), %s166_s8, 128  }
  0x3a   : > { %569 = vsyncadd (%p665_p8), %s166_s8, 4294967168  ;;  %s738_s30 = scalar_lea.vmem [#allocation5], %s400_s7  ;;  %v601_v0 = vmov 0.0   ;;  %vm217_vm0 = vcmask 1041408   ;;  %v207_v1 = vld [vmem:[%s169_s15] sm:$0x3] }
  0x3b   : > { %206 = vst [vmem:[%s738_s30] sm:$0xff] %v601_v0  ;;  %v208_v2 = vld [vmem:[%s169_s15 + $0x2] sm:$0x3]  ;;  %v209_v3 = vld [vmem:[%s169_s15 + $0x4] sm:$0x3]  ;;  %v210_v4 = vld [vmem:[%s169_s15 + $0x6] sm:$0x3] }
  0x3c   : > { %v218_v5 = vsel %vm217_vm0, %v207_v1, -inf  ;;  %v219_v6 = vsel %vm217_vm0, %v208_v2, -inf  ;;  %v220_v7 = vsel %vm217_vm0, %v209_v3, -inf  ;;  %v221_v8 = vsel %vm217_vm0, %v210_v4, -inf  ;;  %p196_p8 = scmp.lt.s32.totalorder %s588_s12, 1  ;;  %s300_s16 = sshll.u32 %s738_s30, 4  ;;  %s773_s16 = int_to_ptr.vmem [resolvable:$true] %s300_s16 }
  0x3d   : > { %v222_v9 = vmax.f32 %v218_v5, %v219_v6  ;;  %v223_v10 = vmax.f32 %v220_v7, %v221_v8  ;;  %s403_s18 = sshll.u32 %s588_s12, 7  ;;  %s287_s26 = scalar_lea.sflag [#allocation4], %s730_s3 }
  0x3e   : > { %s197_s21 = scalar_select %p196_p8, %s588_s12, 1 }
  0x3f   : > { %v746_v11 = vmax.f32 %v222_v9, %v223_v10  ;;  %s778_s25 = scalar_lea.hbm %s828_s2, %s403_s18  ;;  %s514_s27 = scalar_lea.vmem %s773_s16, 128 }
  0x40   : > { %s201_s6 = scalar_lea.vmem %s827_s1, %s197_s21  ;;  %p515_p9 = scmp.ne.s32.totalorder %s773_s16, %s514_s27 }
  0x41   : > { %v236_v12 = vsub.f32 %v207_v1, %v746_v11  ;;  %v237_v13 = vsub.f32 %v208_v2, %v746_v11  ;;  %v238_v14 = vsub.f32 %v209_v3, %v746_v11  ;;  %v239_v15 = vsub.f32 %v210_v4, %v746_v11  ;;  %v211_v20 = vld [vmem:[%s201_s6] sm:$0x1]  ;;  %p836_p11 = scmp.ne.s32.totalorder %s832_s22, 0  ;;  %s602_s12 = smov [#allocation5]  }
  0x42   : > { %v212_v21 = vunpack.c.0.s8 %v211_v20  ;;  %v276_v7 = vld [vmem:[%s738_s30] sm:$0x1]  ;;  %s518_s28 = sshll.u32 %s602_s12, 4  ;;  %s519_s28 = int_to_ptr.vmem [resolvable:$false] %s518_s28 }
  0x43   : > { %v240_v16 = vmul.f32 1.442695, %v236_v12  ;;  %v242_v17 = vmul.f32 1.442695, %v237_v13  ;;  %v244_v18 = vmul.f32 1.442695, %v238_v14  ;;  %p516_p0 = pnand %p515_p9, %p836_p11  ;;  %p521_p13 = scmp.lt.s32.totalorder %s773_s16, %s519_s28 }
  0x44   : > { %v246_v19 = vmul.f32 1.442695, %v239_v15  ;;  %vm213_vm1 = vcmp.eq.s32.totalorder %v212_v21, 0  ;;  %vm214_vm2 = vcmp.eq.s32.totalorder %v212_v21, 1  ;;  %vm215_vm3 = vcmp.eq.s32.totalorder %v212_v21, 2  ;;  %s520_s29 = scalar_lea.vmem %s519_s28, 256 }
  0x45   : > { %472 = vpow2.f32 %v240_v16  ;;  %v225_v26 = vsel %vm213_vm1, %v207_v1, 0.0  ;;  %v226_v27 = vsel %vm214_vm2, %v208_v2, 0.0  ;;  %v227_v40 = vsel %vm215_vm3, %v209_v3, 0.0  ;;  %p517_p6 = pneg %p516_p0  ;;  %p522_p2 = scmp.lt.s32.totalorder %s520_s29, %s514_s27 }
  0x46   : > { %474 = vpow2.f32 %v242_v17  ;;  %v229_v36 = vsel %vm217_vm0, %v225_v26, 0.0  ;;  %v230_v37 = vsel %vm217_vm0, %v226_v27, 0.0  ;;  %vm216_vm4 = vcmp.eq.s32.totalorder %v212_v21, 3 }
  0x47   : > { %476 = vpow2.f32 %v244_v18  ;;  %v231_v43 = vadd.f32 %v230_v37, %v229_v36  ;;  %v232_v45 = vsel %vm217_vm0, %v227_v40, 0.0  ;;  %v228_v47 = vsel %vm216_vm4, %v210_v4, 0.0  ;;  %p523_p5 = por %p522_p2, %p521_p13 }
  0x48   : > { %478 = vpow2.f32 %v246_v19  ;;  %v234_v51 = vsel %vm217_vm0, %v228_v47, 0.0 }
  0x49   : > { %v233_v49 = vadd.f32 %v232_v45, %v231_v43  ;;  %p524_p4 = pnand %p523_p5, %p517_p6 }
  0x4b   : > { %v235_v53 = vadd.f32 %v234_v51, %v233_v49 }
  0x4d   : > { %v268_v58 = vsub.f32 %v746_v11, %v235_v53 }
  0x4f   : > { %v473_v22 = vpop.eup %472 }
  0x50   : > { %v475_v23 = vpop.eup %474  ;;  %v248_v24 = vsel %vm217_vm0, %v473_v22, 0.0  ;;  %v255_v32 = vsel %vm213_vm1, %v473_v22, 0.0 }
  0x51   : > { %v477_v25 = vpop.eup %476  ;;  %v249_v28 = vsel %vm217_vm0, %v475_v23, 0.0  ;;  %v256_v33 = vsel %vm214_vm2, %v475_v23, 0.0  ;;  %v259_v38 = vsel %vm217_vm0, %v255_v32, 0.0 }
  0x52   : > { %v479_v29 = vpop.eup %478  ;;  %v250_v30 = vadd.f32 %v249_v28, %v248_v24  ;;  %v251_v31 = vsel %vm217_vm0, %v477_v25, 0.0  ;;  %v260_v39 = vsel %vm217_vm0, %v256_v33, 0.0  ;;  %v257_v42 = vsel %vm215_vm3, %v477_v25, 0.0 }
  0x53   : > { %v253_v34 = vsel %vm217_vm0, %v479_v29, 0.0  ;;  %v261_v44 = vadd.f32 %v260_v39, %v259_v38  ;;  %v262_v46 = vsel %vm217_vm0, %v257_v42, 0.0  ;;  %v258_v48 = vsel %vm216_vm4, %v479_v29, 0.0 }
  0x54   : > { %v252_v35 = vadd.f32 %v251_v31, %v250_v30  ;;  %v264_v52 = vsel %vm217_vm0, %v258_v48, 0.0 }
  0x55   : > { %v263_v50 = vadd.f32 %v262_v46, %v261_v44 }
  0x56   : > { %v254_v41 = vadd.f32 %v253_v34, %v252_v35 }
  0x57   : > { %v265_v54 = vadd.f32 %v264_v52, %v263_v50 }
  0x58   : > { %480 = vlog2.f32 %v254_v41 }
  0x59   : > { %482 = vrcp.f32 %v254_v41 }
  0x62   : > { %v481_v55 = vpop.eup %480 }
  0x63   : > { %v483_v56 = vpop.eup %482  ;;  %v267_v57 = vmul.f32 0.6931472, %v481_v55 }
  0x64   : > { %v271_v59 = vmul.f32 %v483_v56, %v265_v54 }
  0x65   : > { %v269_v61 = vadd.f32 %v268_v58, %v267_v57 }
  0x66   : > { %v272_v60 = vsub.f32 1.0, %v271_v59 }
  0x68   : > { %v273_v62 = vmax.f32 %v272_v60, 0.0 }
  0x6a   : > { %v274_v63 = vmul.f32 %v273_v62, %v273_v62 }
  0x6c   : > { %v275_v0 = vmul.f32 %v274_v63, %v269_v61 }
  0x6e   : > { %v277_v1 = vsel %vm217_vm0, %v275_v0, 0.0 }
  0x6f   : > { %v278_v2 = vrot.slane %v277_v1, 4 }
  0x71   : > { %v279_v3 = vadd.f32 %v278_v2, %v277_v1 }
  0x73   : > { %v280_v4 = vrot.slane %v279_v3, 2 }
  0x75   : > { %v281_v5 = vadd.f32 %v280_v4, %v279_v3 }
  0x77   : > { %v282_v6 = vrot.slane %v281_v5, 1 }
  0x79   : > { %v283_v8 = vadd.f32 %v282_v6, %v281_v5 }
  0x7b   : > { %v284_v9 = vadd.f32 %v283_v8, %v276_v7 }
  0x7d   : > { %285 = vst [vmem:[%s738_s30] sm:$0x1] %v284_v9 }
  0x7e   : > { %527 = shalt.err (!%p524_p4)
}
  0x7f   : > { %s528_s3 = scalar_lea.hbm %s778_s25, 128  ;;  %s532_s15 = scalar_lea.hbm %s828_s2, 256 }
  0x80   : > { %p529_p7 = scmp.ne.s32.totalorder %s778_s25, %s528_s3  ;;  %p533_p1 = scmp.lt.u32.totalorder %s778_s25, %s828_s2 }
  0x81   : > { %p534_p3 = scmp.lt.u32.totalorder %s532_s15, %s528_s3  ;;  %p536_p9 = scmp.lt.u32.totalorder %s528_s3, %s778_s25 }
  0x82   : > { %p530_p10 = pnand %p529_p7, %p836_p11 }
  0x83   : > { %p535_p8 = por %p534_p3, %p533_p1 }
  0x84   : > { %p531_p12 = pneg %p530_p10 }
  0x85   : > { %p537_p0 = por %p536_p9, %p535_p8 }
  0x87   : > { %p538_p6 = pnand %p537_p0, %p531_p12 }
  0x89   : > { %541 = shalt.err (!%p538_p6)
}
  0x8a   : > { %409 = dma.vmem_to_hbm [thread:$0]  (%p836_p11), %s773_s16, 128, %s778_s25, %s287_s26  }
  0x8b PF: > { %s312_s4 = sand.u32 1, %s576_s9   ;;  %p837_p13 = scmp.ne.s32.totalorder %s833_s24, 0 }
  0x8c   : > { %p838_p2 = scmp.ge.s32.totalorder %s596_s14, 2  ;;  %s313_s5 = scalar_lea.sflag [#allocation4], %s312_s4 }
  0x8e   : > { %p416_p5 = pnand %p838_p2, %p837_p13 }
  0x90   : > { %571 = dma.done.wait (!%p416_p5), %s313_s5, 128  }
  0x91   : > { %573 = vsyncadd (!%p416_p5), %s313_s5, 4294967168  ;;  %s18_s14 = sadd.s32 1, %s596_s14   ;;  %s839_s9 = smov %s580_s10 }
  0x92   : > { %p15_p4 = scmp.ge.s32.totalorder %s18_s14, 4   ;;  %s840_s10 = smov %s584_s11 }
  0x93   : > { %s841_s11 = smov %s674_s23  ;;  %s842_s12 = smov %s592_s13 }
  0x94   : > { %s843_s13 = smov %s845_s17  ;;  %17 = sbr.rel (!%p15_p4) target bundleno = 6 (0x6), region = 80 }
  0x9b   :  { %318 = vsyncpa [#allocation3], 1 }
  0x9c   :  { %320 = vsyncpa [#allocation3 + $0x1], 1 }
  0x9d   :  { %321 = vsyncpa [#allocation4], 1 }
  0x9e   :  { %323 = vsyncpa [#allocation4 + $0x1], 1 }

</bundles_post_ra>
